<compile_context>
chip_gen: v6e
topology: v6e:2x2x1
jax: 0.10.0
libtpu: 0.0.40
codegen_flags: <defaults>
</compile_context>

<pallas_src>
import functools

import jax
import jax.numpy as jnp
from jax import lax
from jax.experimental import pallas as pl
from jax.experimental.pallas import tpu as pltpu


GAMMA = 2.0          # focal loss exponent (hard-wired as a square below)
IGNORE_INDEX = -1
EPS = 1e-7
SMOOTH = 0.0


def _dice_focal_kernel(pred_ref, tgt_ref,
                       inter_ref, psum_ref, tsum_ref, fsum_ref, cnt_ref,
                       *, hw, tile_hw, t_per_split, num_classes, needs_mask):
    s = pl.program_id(1)          # pixel-stream shard (megacore "parallel" axis)
    t = pl.program_id(2)          # tile index inside the shard ("arbitrary" reduction axis)

    # Zero the per-(batch, shard) resident accumulators at the start of the pixel loop.
    @pl.when(t == 0)
    def _():
        inter_ref[...] = jnp.zeros_like(inter_ref)
        psum_ref[...] = jnp.zeros_like(psum_ref)
        tsum_ref[...] = jnp.zeros_like(tsum_ref)
        fsum_ref[...] = jnp.zeros_like(fsum_ref)
        cnt_ref[...] = jnp.zeros_like(cnt_ref)

    logits = pred_ref[0].astype(jnp.float32)          # (C, T): class on sublanes, pixels on lanes
    tgt = tgt_ref[0]                                  # (1, T) int32, -1 == ignore

    if needs_mask:
        # Global pixel index of each lane. Tiles past the end of the image (ragged tail and
        # clamped duplicate tiles from the shard split) are fully masked out here, so the
        # wrapper never has to pad the inputs in HBM. Statically elided when hw divides evenly.
        tile_idx = s * t_per_split + t
        pix = tile_idx * tile_hw + lax.broadcasted_iota(jnp.int32, (1, tile_hw), 1)
        in_bounds = pix < hw                          # (1, T)
        tgt = jnp.where(in_bounds, tgt, IGNORE_INDEX)
        # Keep this guard whenever masking is possible: the OOB block can hold stale NaN/Inf
        # bit patterns that would poison the sums via NaN*0.
        logits = jnp.where(in_bounds, logits, 0.0)

    validf = (tgt >= 0).astype(jnp.float32)           # (1, T)

    # Numerically stable softmax over the class (sublane) axis.
    m = jnp.max(logits, axis=0, keepdims=True)        # (1, T)
    shifted = logits - m                              # (C, T)
    e = jnp.exp(shifted)                              # (C, T)
    denom = jnp.sum(e, axis=0, keepdims=True)         # (1, T), >= 1
    probs = e * pl.reciprocal(denom, approx=True)     # (C, T)  (EUP slot, ~free)

    cls_ids = lax.broadcasted_iota(jnp.int32, (num_classes, tile_hw), 0)
    onehot = (cls_ids == tgt).astype(jnp.float32)     # (C, T); all-zero column when ignored

    # Shared product: onehot is already zero for ignored pixels, so no extra valid mask needed.
    po = probs * onehot                               # (C, T)
    y_pred = probs * validf                           # (C, T)  (smp masks predictions too)

    # ---- Dice statistics ----
    inter_ref[...] += jnp.sum(po, axis=-1, keepdims=True).reshape(1, num_classes, 1)
    psum_ref[...] += jnp.sum(y_pred, axis=-1, keepdims=True).reshape(1, num_classes, 1)
    tsum_ref[...] += jnp.sum(onehot, axis=-1, keepdims=True).reshape(1, num_classes, 1)

    # ---- Focal statistics: (1 - pt)^2 * CE, averaged over valid pixels in the epilogue ----
    pt = jnp.sum(po, axis=0, keepdims=True)                                      # (1, T)
    # Stable logpt from shifted logits (avoids pt-underflow blowups for huge wrong margins).
    logpt = jnp.sum(shifted * onehot, axis=0, keepdims=True) - jnp.log(denom) * validf
    focal = jnp.square(1.0 - pt) * (-logpt)           # exactly zero for ignored pixels
    fsum_ref[...] += jnp.sum(focal, axis=-1, keepdims=True).reshape(1, 1, 1)
    cnt_ref[...] += jnp.sum(validf, axis=-1, keepdims=True).reshape(1, 1, 1)


def _detect_num_par():
    """Shard the pixel stream across TensorCores only on multi-TC chips (v7x)."""
    try:
        kind = jax.devices()[0].device_kind.lower()
    except Exception:
        return 1
    return 2 if "v7" in kind else 1


def _pick_tile_hw(hw, target_elems, n_split_hint):
    """Pick a lane-tile size: full extent if it fits, else prefer a 128-multiple divisor of hw
    (so the ragged-tail mask can be statically elided), else the largest 128-multiple <= target."""
    if hw <= target_elems:
        return hw                                      # full-extent block: always legal
    base = max(128, (target_elems // 128) * 128)
    for prefer_even_split in (True, False):
        t = base
        while t >= 128:
            if hw % t == 0:
                n_tiles = hw // t
                if (not prefer_even_split) or (n_tiles % n_split_hint == 0):
                    return t
            t -= 128
    return base


@functools.partial(jax.jit, static_argnames=("num_par", "tile_hw"))
def dice_focal_loss(pred_nchw, target_nhw, weight_dice=0.5, weight_focal=0.5,
                    num_par=None, tile_hw=None):
    n, c, h, w = pred_nchw.shape
    hw = h * w

    pred = pred_nchw.reshape(n, c, hw)                     # contiguous: no HBM copy, native dtype
    tgt = target_nhw.reshape(n, 1, hw).astype(jnp.int32)   # contiguous: no HBM copy

    if num_par is None:
        num_par = _detect_num_par()

    if tile_hw is None:
        # ~1 MiB of *input* bytes per pred block (dtype-aware), lane dim a multiple of 128.
        # Cap at 64K lanes so the f32 intermediates stay well inside v7x's 64 MiB VMEM.
        itemsize = jnp.dtype(pred_nchw.dtype).itemsize
        target_elems = max(512, min(65536, (1 << 20) // (itemsize * max(c, 1))))
        tile_hw = _pick_tile_hw(hw, target_elems, max(1, num_par))

    n_tiles = -(-hw // tile_hw)
    n_split = max(1, min(num_par, n_tiles))                # pixel-stream shards (v7x megacore)
    t_per_split = -(-n_tiles // n_split)
    last_tile = n_tiles - 1
    # Static flag: only emit the iota/compare/select masking code when a ragged tail or a
    # clamped duplicate tile can actually occur.
    needs_mask = (hw % tile_hw != 0) or (n_tiles % n_split != 0)

    def data_map(b, s, t):
        # Clamp so duplicated tail tiles never issue an out-of-range DMA; the kernel masks
        # them out by global pixel index, so clamped duplicates contribute exactly zero.
        return (b, 0, jnp.minimum(s * t_per_split + t, last_tile))

    kernel = functools.partial(_dice_focal_kernel, hw=hw, tile_hw=tile_hw,
                               t_per_split=t_per_split, num_classes=c,
                               needs_mask=needs_mask)

    n_acc = n * n_split
    cls_spec = pl.BlockSpec((1, c, 1), lambda b, s, t: (b * n_split + s, 0, 0))
    scl_spec = pl.BlockSpec((1, 1, 1), lambda b, s, t: (b * n_split + s, 0, 0))

    cost = pl.CostEstimate(
        flops=int(18 * n * c * hw),
        transcendentals=int(n * hw * (c + 2)),
        bytes_accessed=int(n * hw * (c * pred.dtype.itemsize + 4)),
    )

    # NOTE: on HBM-bound v5e with f32 inputs, adding pipeline_mode=pl.Buffered(3) to the pred
    # BlockSpec can hide DMA jitter if an xprof trace shows exposed DMA; left at the default.
    inter, psum, tsum, fsum, cnt = pl.pallas_call(
        kernel,
        out_shape=(
            jax.ShapeDtypeStruct((n_acc, c, 1), jnp.float32),
            jax.ShapeDtypeStruct((n_acc, c, 1), jnp.float32),
            jax.ShapeDtypeStruct((n_acc, c, 1), jnp.float32),
            jax.ShapeDtypeStruct((n_acc, 1, 1), jnp.float32),
            jax.ShapeDtypeStruct((n_acc, 1, 1), jnp.float32),
        ),
        grid_spec=pltpu.PrefetchScalarGridSpec(
            num_scalar_prefetch=0,
            grid=(n, n_split, t_per_split),
            in_specs=[
                pl.BlockSpec((1, c, tile_hw), data_map),   # logits: class on sublanes
                pl.BlockSpec((1, 1, tile_hw), data_map),   # labels: lane-dense
            ],
            out_specs=[cls_spec, cls_spec, cls_spec, scl_spec, scl_spec],
        ),
        compiler_params=pltpu.CompilerParams(
            dimension_semantics=("parallel", "parallel", "arbitrary"),
            vmem_limit_bytes=32 * 1024 * 1024,
        ),
        cost_estimate=cost,
    )(pred, tgt)

    # ---- Tiny O(C) epilogue (plain JAX glue) ----
    inter = jnp.sum(inter[..., 0], axis=0)                 # (C,)
    psum = jnp.sum(psum[..., 0], axis=0)
    tsum = jnp.sum(tsum[..., 0], axis=0)
    fsum = jnp.sum(fsum)
    cnt = jnp.sum(cnt)

    cardinality = psum + tsum
    dice_score = (2.0 * inter + SMOOTH) / jnp.maximum(cardinality + SMOOTH, EPS)
    class_present = (tsum > 0).astype(jnp.float32)
    dice_loss = jnp.mean((1.0 - dice_score) * class_present)
    focal_loss = fsum / jnp.maximum(cnt, 1.0)

    return weight_dice * dice_loss + weight_focal * focal_loss


def _reference(pred_nchw, target_nhw, weight_dice=0.5, weight_focal=0.5):
    """Pure-JAX reference matching the PyTorch semantics, for validation."""
    n, c, h, w = pred_nchw.shape
    logits = jnp.transpose(pred_nchw, (0, 2, 3, 1)).reshape(-1, c).astype(jnp.float32)
    t = target_nhw.reshape(-1)
    valid = (t >= 0).astype(jnp.float32)
    logp = jax.nn.log_softmax(logits, axis=-1)
    probs = jnp.exp(logp)
    onehot = jax.nn.one_hot(jnp.where(t >= 0, t, 0), c) * valid[:, None]
    y_pred = probs * valid[:, None]
    inter = jnp.sum(y_pred * onehot, axis=0)
    card = jnp.sum(y_pred + onehot, axis=0)
    dice = (2.0 * inter + SMOOTH) / jnp.maximum(card + SMOOTH, EPS)
    dloss = jnp.mean((1.0 - dice) * (jnp.sum(onehot, axis=0) > 0))
    logpt = jnp.sum(logp * onehot, axis=-1)
    pt = jnp.exp(logpt)
    floss = jnp.sum(jnp.square(1.0 - pt) * (-logpt) * valid) / jnp.maximum(jnp.sum(valid), 1.0)
    return weight_dice * dloss + weight_focal * floss


if __name__ == "__main__":
    key = jax.random.PRNGKey(0)
    k1, k2, k3, k4 = jax.random.split(key, 4)

    # Tolerances account for the approximate EUP reciprocal in the softmax (~1e-3 relative).
    TOL = 2e-3

    # Case 1: canonical small shape (single full-extent pixel tile, mask statically elided).
    N, C, H, W = 2, 4, 16, 16
    pred = jax.random.normal(k1, (N, C, H, W), dtype=jnp.float32)
    target = jax.random.randint(k2, (N, H, W), -1, C, dtype=jnp.int32)  # -1 == ignore
    loss = jax.block_until_ready(dice_focal_loss(pred, target))
    ref = jax.block_until_ready(_reference(pred, target))
    assert jnp.allclose(loss, ref, atol=TOL, rtol=TOL), (loss, ref)

    # Case 2: force a small tile + 2-way shard split to exercise the multi-tile / ragged-tail /
    # clamped-duplicate-tile masked path (needs_mask=True).
    N2, C2, H2, W2 = 1, 3, 64, 64
    pred2 = jax.random.normal(k3, (N2, C2, H2, W2), dtype=jnp.float32)
    target2 = jax.random.randint(k4, (N2, H2, W2), -1, C2, dtype=jnp.int32)
    loss2 = jax.block_until_ready(dice_focal_loss(pred2, target2, tile_hw=384, num_par=2))
    ref2 = jax.block_until_ready(_reference(pred2, target2))
    assert jnp.allclose(loss2, ref2, atol=TOL, rtol=TOL), (loss2, ref2)

    print("KERNEL_OK")
</pallas_src>

<mosaic_0001>
module attributes {stable_mosaic.version = 11 : i64} {
  func.func @_dice_focal_kernel(%arg0: i32, %arg1: i32, %arg2: i32, %arg3: memref<1x4x256xf32, #tpu.memory_space<vmem>>, %arg4: memref<1x1x256xi32, #tpu.memory_space<vmem>>, %arg5: memref<1x4x1xf32, #tpu.memory_space<vmem>>, %arg6: memref<1x4x1xf32, #tpu.memory_space<vmem>>, %arg7: memref<1x4x1xf32, #tpu.memory_space<vmem>>, %arg8: memref<1x1x1xf32, #tpu.memory_space<vmem>>, %arg9: memref<1x1x1xf32, #tpu.memory_space<vmem>>) attributes {dimension_semantics = [#tpu.dimension_semantics<parallel>, #tpu.dimension_semantics<parallel>, #tpu.dimension_semantics<arbitrary>], iteration_bounds = array<i64: 2, 1, 1>, scalar_prefetch = 0 : i64, scratch_operands = 0 : i64, tpu.core_type = #tpu.core_type<tc>, window_params = [{transform_indices = @transform_0, window_bounds = array<i64: 1, 4, 256>}, {transform_indices = @transform_1, window_bounds = array<i64: 1, 1, 256>}, {transform_indices = @transform_2, window_bounds = array<i64: 1, 4, 1>}, {transform_indices = @transform_3, window_bounds = array<i64: 1, 4, 1>}, {transform_indices = @transform_4, window_bounds = array<i64: 1, 4, 1>}, {transform_indices = @transform_5, window_bounds = array<i64: 1, 1, 1>}, {transform_indices = @transform_6, window_bounds = array<i64: 1, 1, 1>}]} {
    %c0_i32 = arith.constant 0 : i32
    %0 = arith.cmpi eq, %arg2, %c0_i32 : i32
    %1 = arith.extui %0 : i1 to i32
    %c0_i32_0 = arith.constant 0 : i32
    %2 = arith.cmpi ne, %1, %c0_i32_0 : i32
    scf.if %2 {
      %cst_47 = arith.constant 0.000000e+00 : f32
      %73 = vector.broadcast %cst_47 : f32 to vector<1x4x1xf32>
      %c0_48 = arith.constant 0 : index
      %c0_49 = arith.constant 0 : index
      %c0_50 = arith.constant 0 : index
      %74 = vector.load %arg5[%c0_48, %c0_49, %c0_50] : memref<1x4x1xf32, #tpu.memory_space<vmem>>, vector<1x4x1xf32>
      tpu.vector_store %arg5[%c0_48, %c0_49, %c0_50], %73 {strides = array<i32>} : memref<1x4x1xf32, #tpu.memory_space<vmem>>, vector<1x4x1xf32>,
      %cst_51 = arith.constant 0.000000e+00 : f32
      %75 = vector.broadcast %cst_51 : f32 to vector<1x4x1xf32>
      %c0_52 = arith.constant 0 : index
      %c0_53 = arith.constant 0 : index
      %c0_54 = arith.constant 0 : index
      %76 = vector.load %arg6[%c0_52, %c0_53, %c0_54] : memref<1x4x1xf32, #tpu.memory_space<vmem>>, vector<1x4x1xf32>
      tpu.vector_store %arg6[%c0_52, %c0_53, %c0_54], %75 {strides = array<i32>} : memref<1x4x1xf32, #tpu.memory_space<vmem>>, vector<1x4x1xf32>,
      %cst_55 = arith.constant 0.000000e+00 : f32
      %77 = vector.broadcast %cst_55 : f32 to vector<1x4x1xf32>
      %c0_56 = arith.constant 0 : index
      %c0_57 = arith.constant 0 : index
      %c0_58 = arith.constant 0 : index
      %78 = vector.load %arg7[%c0_56, %c0_57, %c0_58] : memref<1x4x1xf32, #tpu.memory_space<vmem>>, vector<1x4x1xf32>
      tpu.vector_store %arg7[%c0_56, %c0_57, %c0_58], %77 {strides = array<i32>} : memref<1x4x1xf32, #tpu.memory_space<vmem>>, vector<1x4x1xf32>,
      %cst_59 = arith.constant 0.000000e+00 : f32
      %79 = vector.broadcast %cst_59 : f32 to vector<1x1x1xf32>
      %c0_60 = arith.constant 0 : index
      %c0_61 = arith.constant 0 : index
      %c0_62 = arith.constant 0 : index
      %80 = vector.load %arg8[%c0_60, %c0_61, %c0_62] : memref<1x1x1xf32, #tpu.memory_space<vmem>>, vector<1x1x1xf32>
      tpu.vector_store %arg8[%c0_60, %c0_61, %c0_62], %79 {strides = array<i32>} : memref<1x1x1xf32, #tpu.memory_space<vmem>>, vector<1x1x1xf32>,
      %cst_63 = arith.constant 0.000000e+00 : f32
      %81 = vector.broadcast %cst_63 : f32 to vector<1x1x1xf32>
      %c0_64 = arith.constant 0 : index
      %c0_65 = arith.constant 0 : index
      %c0_66 = arith.constant 0 : index
      %82 = vector.load %arg9[%c0_64, %c0_65, %c0_66] : memref<1x1x1xf32, #tpu.memory_space<vmem>>, vector<1x1x1xf32>
      tpu.vector_store %arg9[%c0_64, %c0_65, %c0_66], %81 {strides = array<i32>} : memref<1x1x1xf32, #tpu.memory_space<vmem>>, vector<1x1x1xf32>,
    } else {
    }
    %c0 = arith.constant 0 : index
    %c0_1 = arith.constant 0 : index
    %c0_2 = arith.constant 0 : index
    %3 = vector.load %arg3[%c0, %c0_1, %c0_2] : memref<1x4x256xf32, #tpu.memory_space<vmem>>, vector<1x4x256xf32>
    %4 = vector.shape_cast %3 : vector<1x4x256xf32> to vector<4x256xf32>
    %c0_3 = arith.constant 0 : index
    %c0_4 = arith.constant 0 : index
    %c0_5 = arith.constant 0 : index
    %5 = vector.load %arg4[%c0_3, %c0_4, %c0_5] : memref<1x1x256xi32, #tpu.memory_space<vmem>>, vector<1x1x256xi32>
    %6 = vector.shape_cast %5 : vector<1x1x256xi32> to vector<1x256xi32>
    %c0_i32_6 = arith.constant 0 : i32
    %7 = vector.broadcast %c0_i32_6 : i32 to vector<1x256xi32>
    %8 = arith.cmpi sge, %6, %7 : vector<1x256xi32>
    %9 = arith.extui %8 : vector<1x256xi1> to vector<1x256xi32>
    %10 = arith.sitofp %9 : vector<1x256xi32> to vector<1x256xf32>
    %cst = arith.constant dense<0xFF800000> : vector<256xf32>
    %11 = vector.multi_reduction <maximumf>, %4, %cst [0] : vector<4x256xf32> to vector<256xf32>
    %12 = vector.shape_cast %11 : vector<256xf32> to vector<1x256xf32>
    %13 = vector.broadcast %12 : vector<1x256xf32> to vector<4x256xf32>
    %14 = arith.subf %4, %13 : vector<4x256xf32>
    %15 = math.exp %14 : vector<4x256xf32>
    %cst_7 = arith.constant dense<0.000000e+00> : vector<256xf32>
    %16 = vector.multi_reduction <add>, %15, %cst_7 [0] : vector<4x256xf32> to vector<256xf32>
    %17 = vector.shape_cast %16 : vector<256xf32> to vector<1x256xf32>
    %18 = tpu.reciprocal %17 {approx = true} : vector<1x256xf32> -> vector<1x256xf32>
    %19 = vector.broadcast %18 : vector<1x256xf32> to vector<4x256xf32>
    %20 = arith.mulf %15, %19 : vector<4x256xf32>
    %21 = tpu.iota {dimensions = array<i32: 0>} : vector<4x256xi32>
    %22 = vector.broadcast %6 : vector<1x256xi32> to vector<4x256xi32>
    %23 = arith.cmpi eq, %21, %22 : vector<4x256xi32>
    %24 = arith.extui %23 : vector<4x256xi1> to vector<4x256xi32>
    %25 = arith.sitofp %24 : vector<4x256xi32> to vector<4x256xf32>
    %26 = arith.mulf %20, %25 : vector<4x256xf32>
    %27 = vector.broadcast %10 : vector<1x256xf32> to vector<4x256xf32>
    %28 = arith.mulf %20, %27 : vector<4x256xf32>
    %c0_8 = arith.constant 0 : index
    %c0_9 = arith.constant 0 : index
    %c0_10 = arith.constant 0 : index
    %29 = vector.load %arg5[%c0_8, %c0_9, %c0_10] : memref<1x4x1xf32, #tpu.memory_space<vmem>>, vector<1x4x1xf32>
    %cst_11 = arith.constant dense<0.000000e+00> : vector<4xf32>
    %30 = vector.multi_reduction <add>, %26, %cst_11 [1] : vector<4x256xf32> to vector<4xf32>
    %31 = vector.shape_cast %30 : vector<4xf32> to vector<4x1xf32>
    %32 = vector.shape_cast %31 : vector<4x1xf32> to vector<1x4x1xf32>
    %33 = arith.addf %29, %32 : vector<1x4x1xf32>
    %c0_12 = arith.constant 0 : index
    %c0_13 = arith.constant 0 : index
    %c0_14 = arith.constant 0 : index
    %34 = vector.load %arg5[%c0_12, %c0_13, %c0_14] : memref<1x4x1xf32, #tpu.memory_space<vmem>>, vector<1x4x1xf32>
    tpu.vector_store %arg5[%c0_12, %c0_13, %c0_14], %33 {strides = array<i32>} : memref<1x4x1xf32, #tpu.memory_space<vmem>>, vector<1x4x1xf32>,
    %c0_15 = arith.constant 0 : index
    %c0_16 = arith.constant 0 : index
    %c0_17 = arith.constant 0 : index
    %35 = vector.load %arg6[%c0_15, %c0_16, %c0_17] : memref<1x4x1xf32, #tpu.memory_space<vmem>>, vector<1x4x1xf32>
    %cst_18 = arith.constant dense<0.000000e+00> : vector<4xf32>
    %36 = vector.multi_reduction <add>, %28, %cst_18 [1] : vector<4x256xf32> to vector<4xf32>
    %37 = vector.shape_cast %36 : vector<4xf32> to vector<4x1xf32>
    %38 = vector.shape_cast %37 : vector<4x1xf32> to vector<1x4x1xf32>
    %39 = arith.addf %35, %38 : vector<1x4x1xf32>
    %c0_19 = arith.constant 0 : index
    %c0_20 = arith.constant 0 : index
    %c0_21 = arith.constant 0 : index
    %40 = vector.load %arg6[%c0_19, %c0_20, %c0_21] : memref<1x4x1xf32, #tpu.memory_space<vmem>>, vector<1x4x1xf32>
    tpu.vector_store %arg6[%c0_19, %c0_20, %c0_21], %39 {strides = array<i32>} : memref<1x4x1xf32, #tpu.memory_space<vmem>>, vector<1x4x1xf32>,
    %c0_22 = arith.constant 0 : index
    %c0_23 = arith.constant 0 : index
    %c0_24 = arith.constant 0 : index
    %41 = vector.load %arg7[%c0_22, %c0_23, %c0_24] : memref<1x4x1xf32, #tpu.memory_space<vmem>>, vector<1x4x1xf32>
    %cst_25 = arith.constant dense<0.000000e+00> : vector<4xf32>
    %42 = vector.multi_reduction <add>, %25, %cst_25 [1] : vector<4x256xf32> to vector<4xf32>
    %43 = vector.shape_cast %42 : vector<4xf32> to vector<4x1xf32>
    %44 = vector.shape_cast %43 : vector<4x1xf32> to vector<1x4x1xf32>
    %45 = arith.addf %41, %44 : vector<1x4x1xf32>
    %c0_26 = arith.constant 0 : index
    %c0_27 = arith.constant 0 : index
    %c0_28 = arith.constant 0 : index
    %46 = vector.load %arg7[%c0_26, %c0_27, %c0_28] : memref<1x4x1xf32, #tpu.memory_space<vmem>>, vector<1x4x1xf32>
    tpu.vector_store %arg7[%c0_26, %c0_27, %c0_28], %45 {strides = array<i32>} : memref<1x4x1xf32, #tpu.memory_space<vmem>>, vector<1x4x1xf32>,
    %cst_29 = arith.constant dense<0.000000e+00> : vector<256xf32>
    %47 = vector.multi_reduction <add>, %26, %cst_29 [0] : vector<4x256xf32> to vector<256xf32>
    %48 = vector.shape_cast %47 : vector<256xf32> to vector<1x256xf32>
    %49 = arith.mulf %14, %25 : vector<4x256xf32>
    %cst_30 = arith.constant dense<0.000000e+00> : vector<256xf32>
    %50 = vector.multi_reduction <add>, %49, %cst_30 [0] : vector<4x256xf32> to vector<256xf32>
    %51 = vector.shape_cast %50 : vector<256xf32> to vector<1x256xf32>
    %52 = math.log %17 : vector<1x256xf32>
    %53 = arith.mulf %52, %10 : vector<1x256xf32>
    %54 = arith.subf %51, %53 : vector<1x256xf32>
    %cst_31 = arith.constant 1.000000e+00 : f32
    %55 = vector.broadcast %cst_31 : f32 to vector<1x256xf32>
    %56 = arith.subf %55, %48 : vector<1x256xf32>
    %57 = arith.mulf %56, %56 : vector<1x256xf32>
    %cst_32 = arith.constant 0.000000e+00 : f32
    %58 = vector.broadcast %cst_32 : f32 to vector<1x256xf32>
    %59 = arith.subf %58, %54 : vector<1x256xf32>
    %60 = arith.mulf %57, %59 : vector<1x256xf32>
    %c0_33 = arith.constant 0 : index
    %c0_34 = arith.constant 0 : index
    %c0_35 = arith.constant 0 : index
    %61 = vector.load %arg8[%c0_33, %c0_34, %c0_35] : memref<1x1x1xf32, #tpu.memory_space<vmem>>, vector<1x1x1xf32>
    %cst_36 = arith.constant dense<0.000000e+00> : vector<1xf32>
    %62 = vector.multi_reduction <add>, %60, %cst_36 [1] : vector<1x256xf32> to vector<1xf32>
    %63 = vector.shape_cast %62 : vector<1xf32> to vector<1x1xf32>
    %64 = vector.shape_cast %63 : vector<1x1xf32> to vector<1x1x1xf32>
    %65 = arith.addf %61, %64 : vector<1x1x1xf32>
    %c0_37 = arith.constant 0 : index
    %c0_38 = arith.constant 0 : index
    %c0_39 = arith.constant 0 : index
    %66 = vector.load %arg8[%c0_37, %c0_38, %c0_39] : memref<1x1x1xf32, #tpu.memory_space<vmem>>, vector<1x1x1xf32>
    tpu.vector_store %arg8[%c0_37, %c0_38, %c0_39], %65 {strides = array<i32>} : memref<1x1x1xf32, #tpu.memory_space<vmem>>, vector<1x1x1xf32>,
    %c0_40 = arith.constant 0 : index
    %c0_41 = arith.constant 0 : index
    %c0_42 = arith.constant 0 : index
    %67 = vector.load %arg9[%c0_40, %c0_41, %c0_42] : memref<1x1x1xf32, #tpu.memory_space<vmem>>, vector<1x1x1xf32>
    %cst_43 = arith.constant dense<0.000000e+00> : vector<1xf32>
    %68 = vector.multi_reduction <add>, %10, %cst_43 [1] : vector<1x256xf32> to vector<1xf32>
    %69 = vector.shape_cast %68 : vector<1xf32> to vector<1x1xf32>
    %70 = vector.shape_cast %69 : vector<1x1xf32> to vector<1x1x1xf32>
    %71 = arith.addf %67, %70 : vector<1x1x1xf32>
    %c0_44 = arith.constant 0 : index
    %c0_45 = arith.constant 0 : index
    %c0_46 = arith.constant 0 : index
    %72 = vector.load %arg9[%c0_44, %c0_45, %c0_46] : memref<1x1x1xf32, #tpu.memory_space<vmem>>, vector<1x1x1xf32>
    tpu.vector_store %arg9[%c0_44, %c0_45, %c0_46], %71 {strides = array<i32>} : memref<1x1x1xf32, #tpu.memory_space<vmem>>, vector<1x1x1xf32>,
    return
  }
  func.func @transform_0(%arg0: i32, %arg1: i32, %arg2: i32) -> (i32, i32, i32) {
    %c1_i32 = arith.constant 1 : i32
    %0 = arith.muli %arg1, %c1_i32 : i32
    %1 = arith.addi %0, %arg2 : i32
    %c0_i32 = arith.constant 0 : i32
    %2 = arith.minsi %1, %c0_i32 : i32
    %c0_i32_0 = arith.constant 0 : i32
    %c0_i32_1 = arith.constant 0 : i32
    return %arg0, %c0_i32_0, %2 : i32, i32, i32
  }
  func.func @transform_1(%arg0: i32, %arg1: i32, %arg2: i32) -> (i32, i32, i32) {
    %c1_i32 = arith.constant 1 : i32
    %0 = arith.muli %arg1, %c1_i32 : i32
    %1 = arith.addi %0, %arg2 : i32
    %c0_i32 = arith.constant 0 : i32
    %2 = arith.minsi %1, %c0_i32 : i32
    %c0_i32_0 = arith.constant 0 : i32
    %c0_i32_1 = arith.constant 0 : i32
    return %arg0, %c0_i32_0, %2 : i32, i32, i32
  }
  func.func @transform_2(%arg0: i32, %arg1: i32, %arg2: i32) -> (i32, i32, i32) {
    %c1_i32 = arith.constant 1 : i32
    %0 = arith.muli %arg0, %c1_i32 : i32
    %1 = arith.addi %0, %arg1 : i32
    %c0_i32 = arith.constant 0 : i32
    %c0_i32_0 = arith.constant 0 : i32
    %c0_i32_1 = arith.constant 0 : i32
    return %1, %c0_i32, %c0_i32_0 : i32, i32, i32
  }
  func.func @transform_3(%arg0: i32, %arg1: i32, %arg2: i32) -> (i32, i32, i32) {
    %c1_i32 = arith.constant 1 : i32
    %0 = arith.muli %arg0, %c1_i32 : i32
    %1 = arith.addi %0, %arg1 : i32
    %c0_i32 = arith.constant 0 : i32
    %c0_i32_0 = arith.constant 0 : i32
    %c0_i32_1 = arith.constant 0 : i32
    return %1, %c0_i32, %c0_i32_0 : i32, i32, i32
  }
  func.func @transform_4(%arg0: i32, %arg1: i32, %arg2: i32) -> (i32, i32, i32) {
    %c1_i32 = arith.constant 1 : i32
    %0 = arith.muli %arg0, %c1_i32 : i32
    %1 = arith.addi %0, %arg1 : i32
    %c0_i32 = arith.constant 0 : i32
    %c0_i32_0 = arith.constant 0 : i32
    %c0_i32_1 = arith.constant 0 : i32
    return %1, %c0_i32, %c0_i32_0 : i32, i32, i32
  }
  func.func @transform_5(%arg0: i32, %arg1: i32, %arg2: i32) -> (i32, i32, i32) {
    %c1_i32 = arith.constant 1 : i32
    %0 = arith.muli %arg0, %c1_i32 : i32
    %1 = arith.addi %0, %arg1 : i32
    %c0_i32 = arith.constant 0 : i32
    %c0_i32_0 = arith.constant 0 : i32
    %c0_i32_1 = arith.constant 0 : i32
    return %1, %c0_i32, %c0_i32_0 : i32, i32, i32
  }
  func.func @transform_6(%arg0: i32, %arg1: i32, %arg2: i32) -> (i32, i32, i32) {
    %c1_i32 = arith.constant 1 : i32
    %0 = arith.muli %arg0, %c1_i32 : i32
    %1 = arith.addi %0, %arg1 : i32
    %c0_i32 = arith.constant 0 : i32
    %c0_i32_0 = arith.constant 0 : i32
    %c0_i32_1 = arith.constant 0 : i32
    return %1, %c0_i32, %c0_i32_0 : i32, i32, i32
  }
}

</mosaic_0001>

<bundles_post_ra>
// kernel: dice_focal_loss.1
= control target key start
LH: loop header
LB: loop body
LE: loop exit
PB: predicated region body
PF: predicated region fallthrough
CT: control target
= control target key end

     0   :  { %s943_s21 = smov 0   ;;  %s945_s22 = smov 0   ;;  %s1055_s0 = inlined_call_operand.vmem [shape: f32[2,4,256], index: 0, kind: input, shape index: {}]   ;;  %s1056_s1 = inlined_call_operand.vmem [shape: s32[2,1,256], index: 1, kind: input, shape index: {}]   ;;  %s1057_s2 = inlined_call_operand.vmem [shape: f32[2,4,1], index: 2, kind: output, shape index: {0}]   ;;  %s1058_s3 = inlined_call_operand.vmem [shape: f32[2,4,1], index: 3, kind: output, shape index: {1}]   ;;  %s1059_s4 = inlined_call_operand.vmem [shape: f32[2,4,1], index: 4, kind: output, shape index: {2}]   ;;  %s1060_s5 = inlined_call_operand.vmem [shape: f32[2,1,1], index: 5, kind: output, shape index: {3}]   ;;  %s1061_s6 = inlined_call_operand.vmem [shape: f32[2,1,1], index: 6, kind: output, shape index: {4}]  }
   0x1   :  { %s947_s23 = smov 0  }
   0x2 LB: > { %s36_s24 = sadd.s32 1, %s901_s22  ;;  %p834_p0 = scmp.ge.s32.totalorder %s905_s23, 1  ;;  %s905_s23 = sphi %s947_s23, %s17_s23   ;;  %s901_s22 = sphi %s945_s22, %s1063_s22   ;;  %s897_s21 = sphi %s943_s21, %s1062_s21  }
   0x3   : > { %p38_p1 = scmp.ge.s32.totalorder %s36_s24, 2  ;;  %p297_p2 = scmp.lt.s32.totalorder %s905_s23, 3 }
   0x5   : > { %s1065_s24 = smov (%p38_p1, %s36_s24), 0  ;;  %p298_p3 = pnand %p834_p0, %p297_p2 }
   0x6   : > { %p367_p4 = scmp.lt.s32.totalorder (!%p298_p3), %s897_s21, 1 }
   0x7   : > { %301 = sbr.rel (%p298_p3) target bundleno = 251 (0xfb), region = 28 }
   0xc   : > { %v487_v0 = vlaneseq  ;;  %s1067_s21 = smov (!%p367_p4, %s897_s21), 1  ;;  %vm441_vm0 = vcmask 1043456   ;;  %vm426_vm1 = vcmask 3072   ;;  %vm600_vm3 = vcmask 1040384  }
   0xd   : > { %s846_s25 = sshll.u32 %s1067_s21, 3  ;;  %s837_s26 = sshll.u32 %s1067_s21, 1  ;;  %v907_v11 = vmov 0.0   ;;  %vm430_vm6 = vcmask 0  }
   0xe   : > { %v488_v1 = vshrl.u32 %v487_v0, 7  ;;  %s374_s29 = scalar_lea.vmem %s1055_s0, %s846_s25  ;;  %s389_s8 = scalar_lea.vmem %s1056_s1, %s837_s26 }
   0xf   : > { %v433_v4 = vld [vmem:[%s374_s29] sm:$0xff]  ;;  %s972_s9 = sshll.u32 %s1067_s21, 2  ;;  %s415_s25 = scalar_lea.vmem %s1060_s5, %s1067_s21 }
  0x10   : > { %v491_v2 = vsub.s32 0, %v488_v1  ;;  %v495_v3 = vsub.s32 1, %v488_v1  ;;  %v434_v5 = vld [vmem:[%s389_s8] sm:$0x3]  ;;  %v439_v6 = vcombine.high %v433_v4, %v433_v4  ;;  %v442_v7 = vsel %vm441_vm0, %v433_v4, -inf  ;;  %s979_s12 = scalar_lea.vmem %s1057_s2, %s972_s9  ;;  %s410_s15 = scalar_lea.vmem %s1059_s4, %s972_s9 }
  0x11   : > { %v443_v10 = vrot.slane %v442_v7, 4  ;;  %vm435_vm2 = vcmp.ge.s32.totalorder %v434_v5, 0  ;;  %427 = vst.msk [vmem:[%s979_s12] sm:$0xf] %vm426_vm1, %v907_v11  ;;  %s404_s18 = scalar_lea.vmem %s1058_s3, %s972_s9  ;;  %429 = vst.msk [vmem:[%s410_s15] sm:$0xf] %vm426_vm1, %v907_v11  ;;  %s420_s28 = scalar_lea.vmem %s1061_s6, %s1067_s21 }
  0x12   : > { %v492_v8 = vrot.slane %v434_v5, %v491_v2  ;;  %v496_v9 = vrot.slane %v434_v5, %v495_v3  ;;  %v449_v12 = vsel %vm441_vm0, %v439_v6, -inf  ;;  %v841_v13 = vsel %vm435_vm2, 1.0, %v907_v11  ;;  %428 = vst.msk [vmem:[%s404_s18] sm:$0xf] %vm426_vm1, %v907_v11 }
  0x13   : > { %v444_v14 = vmax.f32 %v442_v7, %v443_v10  ;;  %v450_v15 = vrot.slane %v449_v12, 4  ;;  %v990_v20 = vrot.slane %v841_v13, %v491_v2  ;;  %v992_v24 = vrot.slane %v841_v13, %v495_v3  ;;  %431 = vst.msk [vmem:[%s415_s25] sm:$0x1] %vm430_vm6, %v907_v11  ;;  %432 = vst.msk [vmem:[%s420_s28] sm:$0x1] %vm430_vm6, %v907_v11 }
  0x14   : > { %vm497_vm4 = vcmp.eq.s32.totalorder %v488_v1, %v492_v8  ;;  %vm498_vm5 = vcmp.eq.s32.totalorder %v488_v1, %v496_v9 }
  0x15   : > { %v842_v16 = vsel %vm497_vm4, 1.0, %v907_v11  ;;  %v843_v17 = vsel %vm498_vm5, 1.0, %v907_v11  ;;  %v445_v21 = vrot.slane %v444_v14, 2  ;;  %v451_v22 = vmax.f32 %v449_v12, %v450_v15 }
  0x16   : > { %v544_v18 = vsel %vm441_vm0, %v842_v16, 0.0  ;;  %v545_v19 = vsel %vm441_vm0, %v843_v17, 0.0  ;;  %v610_v25 = vsel %vm600_vm3, %v990_v20, 0.0  ;;  %v517_v28 = vcombine.low %v990_v20, %v992_v24 }
  0x17   : > { %v546_v23 = vadd.f32 %v545_v19, %v544_v18  ;;  %v446_v26 = vmax.f32 %v444_v14, %v445_v21  ;;  %v452_v27 = vrot.slane %v451_v22, 2  ;;  %v611_v29 = vsel %vm600_vm3, %v992_v24, 0.0 }
  0x18   : > { %v1000_v30 = vadd.f32 %v611_v29, %v610_v25  ;;  %v505_v48 = vcombine.low %v842_v16, %v843_v17 }
  0x19   : > { %547 = vadd.xlane.f32.xlu1 %v546_v23  ;;  %v447_v31 = vrot.slane %v446_v26, 1  ;;  %v453_v32 = vmax.f32 %v451_v22, %v452_v27 }
  0x1a   : > { %v599_v11 = vld [vmem:[%s415_s25] sm:$0x1] }
  0x1b   : > { %v448_v33 = vmax.f32 %v446_v26, %v447_v31  ;;  %v454_v34 = vrot.slane %v453_v32, 1 }
  0x1d   : > { %v455_v35 = vmax.f32 %v453_v32, %v454_v34 }
  0x1f   : > { %v458_v36 = vcombine.low %v448_v33, %v455_v35 }
  0x21   : > { %v460_v37 = vsub.f32 %v433_v4, %v458_v36 }
  0x23   : > { %v461_v38 = vmul.f32 1.442695, %v460_v37  ;;  %v563_v53 = vmul.f32 %v505_v48, %v460_v37 }
  0x25   : > { %873 = vpow2.f32 %v461_v38  ;;  %v565_v57 = vcombine.high %v563_v53, %v563_v53  ;;  %v567_v58 = vsel %vm441_vm0, %v563_v53, 0.0 }
  0x26   : > { %v568_v60 = vrot.slane %v567_v58, 4 }
  0x27   : > { %v574_v59 = vsel %vm441_vm0, %v565_v57, 0.0  ;;  %v520_v57 = vld [vmem:[%s979_s12] sm:$0xf] }
  0x28   : > { %v575_v61 = vrot.slane %v574_v59, 4  ;;  %v569_v62 = vadd.f32 %v568_v60, %v567_v58  ;;  %v532_v60 = vld [vmem:[%s404_s18] sm:$0xf] }
  0x2a   : > { %v576_v63 = vadd.f32 %v575_v61, %v574_v59  ;;  %v570_v1 = vrot.slane %v569_v62, 2 }
  0x2c   : > { %v577_v4 = vrot.slane %v576_v63, 2  ;;  %v571_v6 = vadd.f32 %v570_v1, %v569_v62 }
  0x2e   : > { %v578_v10 = vadd.f32 %v577_v4, %v576_v63  ;;  %v572_v16 = vrot.slane %v571_v6, 1  ;;  %v609_v63 = vld [vmem:[%s420_s28] sm:$0x1] }
  0x30   : > { %v579_v23 = vrot.slane %v578_v10, 1  ;;  %v573_v29 = vadd.f32 %v572_v16, %v571_v6 }
  0x32   : > { %v874_v39 = vpop.eup %873  ;;  %v580_v37 = vadd.f32 %v579_v23, %v578_v10 }
  0x33   : > { %v464_v40 = vcombine.high %v874_v39, %v874_v39  ;;  %v466_v41 = vsel %vm441_vm0, %v874_v39, 0.0 }
  0x34   : > { %v467_v42 = vrot.slane %v466_v41, 4 }
  0x35   : > { %v473_v43 = vsel %vm441_vm0, %v464_v40, 0.0 }
  0x36   : > { %v468_v44 = vadd.f32 %v467_v42, %v466_v41  ;;  %v474_v45 = vrot.slane %v473_v43, 4 }
  0x38   : > { %v469_v46 = vrot.slane %v468_v44, 2  ;;  %v475_v47 = vadd.f32 %v474_v45, %v473_v43 }
  0x3a   : > { %v470_v49 = vadd.f32 %v469_v46, %v468_v44  ;;  %v476_v50 = vrot.slane %v475_v47, 2 }
  0x3c   : > { %v471_v51 = vrot.slane %v470_v49, 1  ;;  %v477_v52 = vadd.f32 %v476_v50, %v475_v47 }
  0x3e   : > { %v472_v54 = vadd.f32 %v471_v51, %v470_v49  ;;  %v478_v55 = vrot.slane %v477_v52, 1 }
  0x40   : > { %v479_v56 = vadd.f32 %v478_v55, %v477_v52  ;;  %875 = vrcp.f32 %v472_v54 }
  0x42   : > { %877 = vrcp.f32 %v479_v56 }
  0x43   : > { %879 = vlog2.f32 %v472_v54  ;;  %v543_v54 = vld [vmem:[%s410_s15] sm:$0xf] }
  0x44   : > { %881 = vlog2.f32 %v479_v56 }
  0x4d   : > { %v876_v0 = vpop.eup %875 }
  0x4f   : > { %v878_v2 = vpop.eup %877 }
  0x50   : > { %v484_v3 = vcombine.low %v876_v0, %v878_v2  ;;  %v880_v7 = vpop.eup %879 }
  0x51   : > { %v882_v12 = vpop.eup %881  ;;  %v582_v18 = vmul.f32 0.6931472, %v880_v7 }
  0x52   : > { %v486_v5 = vmul.f32 %v874_v39, %v484_v3 }
  0x53   : > { %v587_v34 = vmul.f32 %v582_v18, %v990_v20 }
  0x54   : > { %v507_v8 = vmul.f32 %v505_v48, %v486_v5  ;;  %v519_v9 = vmul.f32 %v517_v28, %v486_v5  ;;  %v584_v28 = vmul.f32 0.6931472, %v882_v12 }
  0x55   : > { %v589_v41 = vsub.f32 %v573_v29, %v587_v34 }
  0x56   : > { %v522_v13 = vcombine.high %v507_v8, %v507_v8  ;;  %v524_v14 = vsel %vm441_vm0, %v507_v8, 0.0  ;;  %v534_v15 = vcombine.high %v519_v9, %v519_v9  ;;  %v536_v21 = vsel %vm441_vm0, %v519_v9, 0.0 }
  0x57   : > { %v551_v17 = vrot.slane %v524_v14, 4  ;;  %v588_v38 = vmul.f32 %v584_v28, %v992_v24  ;;  %v595_v47 = vsub.f32 0.0, %v589_v41 }
  0x58   : > { %v525_v19 = vsel %vm441_vm0, %v522_v13, 0.0  ;;  %v537_v22 = vsel %vm441_vm0, %v534_v15, 0.0 }
  0x59   : > { %v526_v25 = vadd.f32 %v525_v19, %v524_v14  ;;  %v552_v26 = vadd.f32 %v551_v17, %v524_v14  ;;  %v557_v27 = vrot.slane %v525_v19, 4  ;;  %v538_v33 = vadd.f32 %v537_v22, %v536_v21 }
  0x5a   : > { %v590_v44 = vsub.f32 %v580_v37, %v588_v38 }
  0x5b   : > { %v553_v31 = vrot.slane %v552_v26, 2  ;;  %v558_v32 = vadd.f32 %v557_v27, %v525_v19  ;;  %527 = vadd.xlane.f32.xlu0 %v526_v25 }
  0x5c   : > { %v596_v49 = vsub.f32 0.0, %v590_v44 }
  0x5d   : > { %v554_v35 = vadd.f32 %v553_v31, %v552_v26  ;;  %v559_v36 = vrot.slane %v558_v32, 2 }
  0x5f   : > { %v555_v39 = vrot.slane %v554_v35, 1  ;;  %v560_v40 = vadd.f32 %v559_v36, %v558_v32  ;;  %539 = vadd.xlane.f32.xlu0 %v538_v33 }
  0x61   : > { %v561_v42 = vrot.slane %v560_v40, 1  ;;  %v556_v43 = vadd.f32 %v555_v39, %v554_v35 }
  0x63   : > { %v562_v45 = vadd.f32 %v561_v42, %v560_v40  ;;  %v591_v46 = vsub.f32 1.0, %v556_v43  ;;  %613 = vadd.xlane.f32.xlu0 %v1000_v30 }
  0x65   : > { %v592_v20 = vsub.f32 1.0, %v562_v45  ;;  %v593_v48 = vmul.f32 %v591_v46, %v591_v46 }
  0x67   : > { %v594_v24 = vmul.f32 %v592_v20, %v592_v20  ;;  %v597_v50 = vmul.f32 %v595_v47, %v593_v48 }
  0x69   : > { %v598_v30 = vmul.f32 %v596_v49, %v594_v24  ;;  %v601_v51 = vsel %vm600_vm3, %v597_v50, 0.0 }
  0x6b   : > { %v602_v52 = vsel %vm600_vm3, %v598_v30, 0.0 }
  0x6c   : > { %v603_v53 = vadd.f32 %v602_v52, %v601_v51 }
  0x6e   : > { %604 = vadd.xlane.f32.xlu1 %v603_v53 }
  0xa2   : > { %v548_v55 = vpop.xlane.xlu1 %547 }
  0xa3   : > { %v549_v56 = vadd.f32 %v548_v55, %v543_v54 }
  0xa5   : > { %550 = vst.msk [vmem:[%s410_s15] sm:$0xf] %vm426_vm1, %v549_v56 }
  0xe4   : > { %v528_v58 = vpop.xlane.xlu0 %527 }
  0xe5   : > { %v529_v59 = vadd.f32 %v528_v58, %v520_v57 }
  0xe7   : > { %531 = vst.msk [vmem:[%s979_s12] sm:$0xf] %vm426_vm1, %v529_v59 }
  0xe8   : > { %v540_v61 = vpop.xlane.xlu0 %539 }
  0xe9   : > { %v541_v62 = vadd.f32 %v540_v61, %v532_v60 }
  0xeb   : > { %542 = vst.msk [vmem:[%s404_s18] sm:$0xf] %vm426_vm1, %v541_v62 }
  0xec   : > { %v614_v0 = vpop.xlane.xlu0 %613 }
  0xed   : > { %v615_v1 = vadd.f32 %v614_v0, %v609_v63 }
  0xef   : > { %616 = vst.msk [vmem:[%s420_s28] sm:$0x1] %vm430_vm6, %v615_v1 }
  0xf7   : > { %v605_v2 = vpop.xlane.xlu1 %604 }
  0xf8   : > { %v606_v3 = vadd.f32 %v605_v2, %v599_v11 }
  0xfa   : > { %608 = vst.msk [vmem:[%s415_s25] sm:$0x1] %vm430_vm6, %v606_v3 }
  0xfb PF: > { %s17_s23 = sadd.s32 1, %s905_s23   ;;  %s1062_s21 = smov %s901_s22 }
  0xfc   : > { %p14_p5 = scmp.ge.s32.totalorder %s17_s23, 4   ;;  %s1063_s22 = smov %s1065_s24 }
  0xfe   :  { %16 = sbr.rel (!%p14_p5) target bundleno = 2 (0x2), region = 113 }

</bundles_post_ra>
